<compile_context>
chip_gen: v7x
topology: tpu7x:2x2x1
jax: 0.10.0
libtpu: 0.0.40
codegen_flags: <defaults>
</compile_context>

<pallas_src>
import functools
import math

import jax
import jax.numpy as jnp
from jax import lax
from jax.experimental import pallas as pl
from jax.experimental.pallas import tpu as pltpu


def _mha_kernel(pad_ref, q_ref, k_ref, v_ref,
                wq_ref, bq_ref, wk_ref, bk_ref, wv_ref, bv_ref,
                wo_ref, bo_ref, out_ref, neg_bias_ref, acc_ref,
                *, d_k, tq, seq_len, d_model, masked):
    f32 = jnp.float32
    bf16 = jnp.bfloat16

    qi = pl.program_id(1)          # query-tile index (for causal offsets)
    h = pl.program_id(2)           # head index (innermost, "arbitrary" axis)
    num_h = pl.num_programs(2)

    # ---- once per (batch, q_tile): build additive mask, init accumulator ----
    @pl.when(h == 0)
    def _init():
        pad = pad_ref[0]                                       # (1, S) 1.0 = padded key
        mask = jnp.broadcast_to(pad, (tq, seq_len))
        if masked:
            row = lax.broadcasted_iota(jnp.int32, (tq, seq_len), 0) + qi * tq
            col = lax.broadcasted_iota(jnp.int32, (tq, seq_len), 1)
            causal = (col > row).astype(f32)
            mask = ((mask + causal) > 0).astype(f32)
        neg_bias_ref[...] = mask * (-1e9)                      # hoisted out of head loop
        # start the output accumulator at the (broadcast) output bias
        acc_ref[...] = jnp.broadcast_to(bo_ref[...], (tq, d_model)).astype(f32)

    # ---- per-head projections (bf16 MXU operands, f32 accumulation) ----
    q_in = q_ref[0].astype(bf16)                               # (tq, d_model)
    k_in = k_ref[0].astype(bf16)                               # (S , d_model)
    v_in = v_ref[0].astype(bf16)                               # (S , d_model)
    wq = wq_ref[0].astype(bf16)                                # (d_model, d_k)
    wk = wk_ref[0].astype(bf16)                                # (d_model, d_k)
    wv = wv_ref[0].astype(bf16)                                # (d_model, d_v)
    wo = wo_ref[0].astype(bf16)                                # (d_v, d_model)

    qh = jnp.dot(q_in, wq, preferred_element_type=f32) + bq_ref[0]   # (tq, d_k)
    kh = jnp.dot(k_in, wk, preferred_element_type=f32) + bk_ref[0]   # (S , d_k)
    vh = jnp.dot(v_in, wv, preferred_element_type=f32) + bv_ref[0]   # (S , d_v)

    # scale q (tq, d_k) instead of the (tq, S) scores: S/d_k less VPU work
    qh = qh * (1.0 / math.sqrt(d_k))

    # scores = q @ k^T via dot_general (no explicit transpose needed)
    scores = lax.dot_general(qh.astype(bf16), kh.astype(bf16),
                             (((1,), (1,)), ((), ())),
                             preferred_element_type=f32)              # (tq, S)
    scores = scores + neg_bias_ref[...]

    # softmax in f32; divide goes to the EUP via approx reciprocal
    scores = scores - jnp.max(scores, axis=-1, keepdims=True)
    e = jnp.exp(scores)
    probs = e * pl.reciprocal(jnp.sum(e, axis=-1, keepdims=True), approx=True)

    ctx = jnp.dot(probs.astype(bf16), vh.astype(bf16),
                  preferred_element_type=f32)                         # (tq, d_v)

    # per-head slice of the output projection, accumulated over heads —
    # this replaces the explicit head concat (concat(ctx_h) @ Wo == sum_h ctx_h @ Wo_h)
    partial = jnp.dot(ctx.astype(bf16), wo, preferred_element_type=f32)  # (tq, d_model)
    acc_ref[...] = acc_ref[...] + partial

    @pl.when(h == num_h - 1)
    def _store():
        out_ref[0] = acc_ref[...].astype(out_ref.dtype)


def multi_head_attention(Q, K, V, pad_mask, params, *,
                         num_heads, d_k, d_v, masked=False, q_tile=None):
    B, S, d_model = Q.shape
    wq, bq, wk, bk, wv, bv, wo, bo = params

    # Head-major weight/bias layouts: every grid step gets a full-extent
    # (d_model, d_k) / (d_v, d_model) block (keeps BlockSpec last dims equal
    # to the full array dims; no in-kernel head slicing).
    wq_h = wq.reshape(d_model, num_heads, d_k).transpose(1, 0, 2)   # (H, d_model, d_k)
    wk_h = wk.reshape(d_model, num_heads, d_k).transpose(1, 0, 2)
    wv_h = wv.reshape(d_model, num_heads, d_v).transpose(1, 0, 2)   # (H, d_model, d_v)
    bq_h = bq.reshape(num_heads, 1, d_k)
    bk_h = bk.reshape(num_heads, 1, d_k)
    bv_h = bv.reshape(num_heads, 1, d_v)
    wo_h = wo.reshape(num_heads, d_v, d_model)                      # (H, d_v, d_model)

    tq = q_tile if q_tile is not None else min(S, 128)
    assert S % tq == 0, "q_tile must divide the sequence length"
    nq = S // tq

    pad3 = pad_mask.reshape(B, 1, S).astype(jnp.float32)

    kernel = functools.partial(_mha_kernel, d_k=d_k, tq=tq, seq_len=S,
                               d_model=d_model, masked=masked)

    grid = (B, nq, num_heads)

    in_specs = [
        pl.BlockSpec((1, 1, S), lambda b, qi, h: (b, 0, 0)),            # pad mask
        pl.BlockSpec((1, tq, d_model), lambda b, qi, h: (b, qi, 0)),    # Q tile
        pl.BlockSpec((1, S, d_model), lambda b, qi, h: (b, 0, 0)),      # K (full keys)
        pl.BlockSpec((1, S, d_model), lambda b, qi, h: (b, 0, 0)),      # V (full keys)
        pl.BlockSpec((1, d_model, d_k), lambda b, qi, h: (h, 0, 0)),    # Wq[h]
        pl.BlockSpec((1, 1, d_k), lambda b, qi, h: (h, 0, 0)),          # bq[h]
        pl.BlockSpec((1, d_model, d_k), lambda b, qi, h: (h, 0, 0)),    # Wk[h]
        pl.BlockSpec((1, 1, d_k), lambda b, qi, h: (h, 0, 0)),          # bk[h]
        pl.BlockSpec((1, d_model, d_v), lambda b, qi, h: (h, 0, 0)),    # Wv[h]
        pl.BlockSpec((1, 1, d_v), lambda b, qi, h: (h, 0, 0)),          # bv[h]
        pl.BlockSpec((1, d_v, d_model), lambda b, qi, h: (h, 0, 0)),    # Wo[h]
        pl.BlockSpec((1, d_model), lambda b, qi, h: (0, 0)),            # bo (grid-invariant)
    ]
    out_specs = pl.BlockSpec((1, tq, d_model), lambda b, qi, h: (b, qi, 0))

    # Explicit VMEM budget from the actual (double-buffered) blocks + scratch,
    # with generous headroom; never rely on the scoped default.
    block_shapes = [
        (1, 1, S), (1, tq, d_model), (1, S, d_model), (1, S, d_model),
        (1, d_model, d_k), (1, 1, d_k), (1, d_model, d_k), (1, 1, d_k),
        (1, d_model, d_v), (1, 1, d_v), (1, d_v, d_model), (1, d_model),
        (1, tq, d_model),
    ]
    bytes_needed = sum(2 * 4 * math.prod(s) for s in block_shapes)
    bytes_needed += 4 * (tq * S + tq * d_model)                 # scratch
    vmem_limit = int(min(max(4 * bytes_needed, 8 << 20), 100 << 20))

    return pl.pallas_call(
        kernel,
        out_shape=jax.ShapeDtypeStruct((B, S, d_model), jnp.float32),
        grid=grid,
        in_specs=in_specs,
        out_specs=out_specs,
        scratch_shapes=[
            pltpu.VMEM((tq, S), jnp.float32),          # hoisted additive mask
            pltpu.VMEM((tq, d_model), jnp.float32),    # per-(b, q_tile) output accumulator
        ],
        compiler_params=pltpu.CompilerParams(
            dimension_semantics=("parallel", "parallel", "arbitrary"),
            vmem_limit_bytes=vmem_limit),
    )(pad3, Q, K, V, wq_h, bq_h, wk_h, bk_h, wv_h, bv_h, wo_h, bo)


def _reference(Q, K, V, pad_mask, params, *, num_heads, d_k, d_v, masked=False):
    """Pure-JAX f32 reference mirroring the PyTorch module."""
    wq, bq, wk, bk, wv, bv, wo, bo = params
    B, S, d_model = Q.shape

    def split(x, d):
        return x.reshape(B, S, num_heads, d).transpose(0, 2, 1, 3)

    hp = jax.lax.Precision.HIGHEST
    Qh = split(jnp.matmul(Q, wq, precision=hp) + bq, d_k)
    Kh = split(jnp.matmul(K, wk, precision=hp) + bk, d_k)
    Vh = split(jnp.matmul(V, wv, precision=hp) + bv, d_v)

    scores = jnp.matmul(Qh, jnp.swapaxes(Kh, -1, -2), precision=hp) / math.sqrt(d_k)
    mask = jnp.broadcast_to(pad_mask[:, None, None, :].astype(jnp.float32), scores.shape)
    if masked:
        causal = jnp.triu(jnp.ones((S, S), jnp.float32), k=1)[None, None]
        mask = ((mask + causal) > 0).astype(jnp.float32)
    scores = scores - 1e9 * mask
    probs = jax.nn.softmax(scores, axis=-1)
    ctx = jnp.matmul(probs, Vh, precision=hp)                        # (B,H,S,d_v)
    ctx = ctx.transpose(0, 2, 1, 3).reshape(B, S, num_heads * d_v)
    return jnp.matmul(ctx, wo, precision=hp) + bo


if __name__ == "__main__":
    B, S, d_model = 2, 16, 32
    num_heads, d_k, d_v = 4, 8, 8

    key = jax.random.PRNGKey(0)
    keys = jax.random.split(key, 12)

    def linear_params(kw, kb, fan_in, fan_out):
        bound = 1.0 / math.sqrt(fan_in)
        w = jax.random.uniform(kw, (fan_in, fan_out), jnp.float32, -bound, bound)
        b = jax.random.uniform(kb, (1, fan_out), jnp.float32, -bound, bound)
        return w, b

    wq, bq = linear_params(keys[0], keys[1], d_model, num_heads * d_k)
    wk, bk = linear_params(keys[2], keys[3], d_model, num_heads * d_k)
    wv, bv = linear_params(keys[4], keys[5], d_model, num_heads * d_v)
    wo, bo = linear_params(keys[6], keys[7], num_heads * d_v, d_model)
    params = (wq, bq, wk, bk, wv, bv, wo, bo)

    Q = jax.random.normal(keys[8], (B, S, d_model), jnp.float32)
    K = jax.random.normal(keys[9], (B, S, d_model), jnp.float32)
    V = jax.random.normal(keys[10], (B, S, d_model), jnp.float32)

    # pad_mask: 1.0 marks padded key positions (as in the PyTorch module).
    lengths = jnp.array([S, 11])
    pad_mask = (jnp.arange(S)[None, :] >= lengths[:, None]).astype(jnp.float32)

    for masked in (False, True):
        out = multi_head_attention(Q, K, V, pad_mask, params,
                                   num_heads=num_heads, d_k=d_k, d_v=d_v,
                                   masked=masked, q_tile=8)
        out = jax.block_until_ready(out)
        ref = _reference(Q, K, V, pad_mask, params, num_heads=num_heads,
                         d_k=d_k, d_v=d_v, masked=masked)
        assert out.shape == (B, S, d_model)
        # bf16 MXU operands + approx reciprocal => compare at bf16-level tolerance.
        assert jnp.allclose(out, ref, atol=2e-2, rtol=2e-2), f"mismatch vs reference (masked={masked})"

    print("KERNEL_OK")
</pallas_src>

<mosaic_0001>
module attributes {stable_mosaic.version = 11 : i64} {
  func.func @_mha_kernel(%arg0: i32, %arg1: i32, %arg2: i32, %arg3: memref<1x1x16xf32, #tpu.memory_space<vmem>>, %arg4: memref<1x8x32xf32, #tpu.memory_space<vmem>>, %arg5: memref<1x16x32xf32, #tpu.memory_space<vmem>>, %arg6: memref<1x16x32xf32, #tpu.memory_space<vmem>>, %arg7: memref<1x32x8xf32, #tpu.memory_space<vmem>>, %arg8: memref<1x1x8xf32, #tpu.memory_space<vmem>>, %arg9: memref<1x32x8xf32, #tpu.memory_space<vmem>>, %arg10: memref<1x1x8xf32, #tpu.memory_space<vmem>>, %arg11: memref<1x32x8xf32, #tpu.memory_space<vmem>>, %arg12: memref<1x1x8xf32, #tpu.memory_space<vmem>>, %arg13: memref<1x8x32xf32, #tpu.memory_space<vmem>>, %arg14: memref<1x32xf32, #tpu.memory_space<vmem>>, %arg15: memref<1x8x32xf32, #tpu.memory_space<vmem>>, %arg16: memref<8x16xf32, #tpu.memory_space<vmem>>, %arg17: memref<8x32xf32, #tpu.memory_space<vmem>>) attributes {dimension_semantics = [#tpu.dimension_semantics<parallel>, #tpu.dimension_semantics<parallel>, #tpu.dimension_semantics<arbitrary>], iteration_bounds = array<i64: 2, 2, 4>, scalar_prefetch = 0 : i64, scratch_operands = 2 : i64, tpu.core_type = #tpu.core_type<tc>, window_params = [{transform_indices = @transform_0, window_bounds = array<i64: 1, 1, 16>}, {transform_indices = @transform_1, window_bounds = array<i64: 1, 8, 32>}, {transform_indices = @transform_2, window_bounds = array<i64: 1, 16, 32>}, {transform_indices = @transform_3, window_bounds = array<i64: 1, 16, 32>}, {transform_indices = @transform_4, window_bounds = array<i64: 1, 32, 8>}, {transform_indices = @transform_5, window_bounds = array<i64: 1, 1, 8>}, {transform_indices = @transform_6, window_bounds = array<i64: 1, 32, 8>}, {transform_indices = @transform_7, window_bounds = array<i64: 1, 1, 8>}, {transform_indices = @transform_8, window_bounds = array<i64: 1, 32, 8>}, {transform_indices = @transform_9, window_bounds = array<i64: 1, 1, 8>}, {transform_indices = @transform_10, window_bounds = array<i64: 1, 8, 32>}, {pipeline_mode = #tpu.pipeline_mode<synchronous>, transform_indices = @transform_11, window_bounds = array<i64: 1, 32>}, {transform_indices = @transform_12, window_bounds = array<i64: 1, 8, 32>}]} {
    %c0_i32 = arith.constant 0 : i32
    %0 = arith.cmpi eq, %arg2, %c0_i32 : i32
    %1 = arith.extui %0 : i1 to i32
    %c0_i32_0 = arith.constant 0 : i32
    %2 = arith.cmpi ne, %1, %c0_i32_0 : i32
    scf.if %2 {
      %c0_45 = arith.constant 0 : index
      %c0_46 = arith.constant 0 : index
      %c0_47 = arith.constant 0 : index
      %67 = vector.load %arg3[%c0_45, %c0_46, %c0_47] : memref<1x1x16xf32, #tpu.memory_space<vmem>>, vector<1x1x16xf32>
      %68 = vector.shape_cast %67 : vector<1x1x16xf32> to vector<1x16xf32>
      %69 = vector.shape_cast %68 : vector<1x16xf32> to vector<1x16xf32>
      %70 = vector.broadcast %69 : vector<1x16xf32> to vector<8x16xf32>
      %cst_48 = arith.constant -1.000000e+09 : f32
      %71 = vector.broadcast %cst_48 : f32 to vector<8x16xf32>
      %72 = arith.mulf %70, %71 : vector<8x16xf32>
      %c0_49 = arith.constant 0 : index
      %c0_50 = arith.constant 0 : index
      %73 = vector.load %arg16[%c0_49, %c0_50] : memref<8x16xf32, #tpu.memory_space<vmem>>, vector<8x16xf32>
      tpu.vector_store %arg16[%c0_49, %c0_50], %72 {strides = array<i32>} : memref<8x16xf32, #tpu.memory_space<vmem>>, vector<8x16xf32>,
      %c0_51 = arith.constant 0 : index
      %c0_52 = arith.constant 0 : index
      %74 = vector.load %arg14[%c0_51, %c0_52] : memref<1x32xf32, #tpu.memory_space<vmem>>, vector<1x32xf32>
      %75 = vector.shape_cast %74 : vector<1x32xf32> to vector<1x32xf32>
      %76 = vector.broadcast %75 : vector<1x32xf32> to vector<8x32xf32>
      %c0_53 = arith.constant 0 : index
      %c0_54 = arith.constant 0 : index
      %77 = vector.load %arg17[%c0_53, %c0_54] : memref<8x32xf32, #tpu.memory_space<vmem>>, vector<8x32xf32>
      tpu.vector_store %arg17[%c0_53, %c0_54], %76 {strides = array<i32>} : memref<8x32xf32, #tpu.memory_space<vmem>>, vector<8x32xf32>,
    } else {
    }
    %c0 = arith.constant 0 : index
    %c0_1 = arith.constant 0 : index
    %c0_2 = arith.constant 0 : index
    %3 = vector.load %arg4[%c0, %c0_1, %c0_2] : memref<1x8x32xf32, #tpu.memory_space<vmem>>, vector<1x8x32xf32>
    %4 = vector.shape_cast %3 : vector<1x8x32xf32> to vector<8x32xf32>
    %5 = arith.truncf %4 : vector<8x32xf32> to vector<8x32xbf16>
    %c0_3 = arith.constant 0 : index
    %c0_4 = arith.constant 0 : index
    %c0_5 = arith.constant 0 : index
    %6 = vector.load %arg5[%c0_3, %c0_4, %c0_5] : memref<1x16x32xf32, #tpu.memory_space<vmem>>, vector<1x16x32xf32>
    %7 = vector.shape_cast %6 : vector<1x16x32xf32> to vector<16x32xf32>
    %8 = arith.truncf %7 : vector<16x32xf32> to vector<16x32xbf16>
    %c0_6 = arith.constant 0 : index
    %c0_7 = arith.constant 0 : index
    %c0_8 = arith.constant 0 : index
    %9 = vector.load %arg6[%c0_6, %c0_7, %c0_8] : memref<1x16x32xf32, #tpu.memory_space<vmem>>, vector<1x16x32xf32>
    %10 = vector.shape_cast %9 : vector<1x16x32xf32> to vector<16x32xf32>
    %11 = arith.truncf %10 : vector<16x32xf32> to vector<16x32xbf16>
    %c0_9 = arith.constant 0 : index
    %c0_10 = arith.constant 0 : index
    %c0_11 = arith.constant 0 : index
    %12 = vector.load %arg7[%c0_9, %c0_10, %c0_11] : memref<1x32x8xf32, #tpu.memory_space<vmem>>, vector<1x32x8xf32>
    %13 = vector.shape_cast %12 : vector<1x32x8xf32> to vector<32x8xf32>
    %14 = arith.truncf %13 : vector<32x8xf32> to vector<32x8xbf16>
    %c0_12 = arith.constant 0 : index
    %c0_13 = arith.constant 0 : index
    %c0_14 = arith.constant 0 : index
    %15 = vector.load %arg9[%c0_12, %c0_13, %c0_14] : memref<1x32x8xf32, #tpu.memory_space<vmem>>, vector<1x32x8xf32>
    %16 = vector.shape_cast %15 : vector<1x32x8xf32> to vector<32x8xf32>
    %17 = arith.truncf %16 : vector<32x8xf32> to vector<32x8xbf16>
    %c0_15 = arith.constant 0 : index
    %c0_16 = arith.constant 0 : index
    %c0_17 = arith.constant 0 : index
    %18 = vector.load %arg11[%c0_15, %c0_16, %c0_17] : memref<1x32x8xf32, #tpu.memory_space<vmem>>, vector<1x32x8xf32>
    %19 = vector.shape_cast %18 : vector<1x32x8xf32> to vector<32x8xf32>
    %20 = arith.truncf %19 : vector<32x8xf32> to vector<32x8xbf16>
    %c0_18 = arith.constant 0 : index
    %c0_19 = arith.constant 0 : index
    %c0_20 = arith.constant 0 : index
    %21 = vector.load %arg13[%c0_18, %c0_19, %c0_20] : memref<1x8x32xf32, #tpu.memory_space<vmem>>, vector<1x8x32xf32>
    %22 = vector.shape_cast %21 : vector<1x8x32xf32> to vector<8x32xf32>
    %23 = arith.truncf %22 : vector<8x32xf32> to vector<8x32xbf16>
    %cst = arith.constant dense<0.000000e+00> : vector<8x8xf32>
    %24 = tpu.matmul %5, %14, %cst {dimension_numbers = #tpu.dot_dimension_numbers<[1], [0], [0], [1], [0, 0, 1, 1], [], []>} : vector<8x32xbf16>, vector<32x8xbf16>, vector<8x8xf32> -> vector<8x8xf32>
    %c0_21 = arith.constant 0 : index
    %c0_22 = arith.constant 0 : index
    %c0_23 = arith.constant 0 : index
    %25 = vector.load %arg8[%c0_21, %c0_22, %c0_23] : memref<1x1x8xf32, #tpu.memory_space<vmem>>, vector<1x1x8xf32>
    %26 = vector.shape_cast %25 : vector<1x1x8xf32> to vector<1x8xf32>
    %27 = vector.broadcast %26 : vector<1x8xf32> to vector<8x8xf32>
    %28 = arith.addf %24, %27 : vector<8x8xf32>
    %cst_24 = arith.constant dense<0.000000e+00> : vector<16x8xf32>
    %29 = tpu.matmul %8, %17, %cst_24 {dimension_numbers = #tpu.dot_dimension_numbers<[1], [0], [0], [1], [0, 0, 1, 1], [], []>} : vector<16x32xbf16>, vector<32x8xbf16>, vector<16x8xf32> -> vector<16x8xf32>
    %c0_25 = arith.constant 0 : index
    %c0_26 = arith.constant 0 : index
    %c0_27 = arith.constant 0 : index
    %30 = vector.load %arg10[%c0_25, %c0_26, %c0_27] : memref<1x1x8xf32, #tpu.memory_space<vmem>>, vector<1x1x8xf32>
    %31 = vector.shape_cast %30 : vector<1x1x8xf32> to vector<1x8xf32>
    %32 = vector.broadcast %31 : vector<1x8xf32> to vector<16x8xf32>
    %33 = arith.addf %29, %32 : vector<16x8xf32>
    %cst_28 = arith.constant dense<0.000000e+00> : vector<16x8xf32>
    %34 = tpu.matmul %11, %20, %cst_28 {dimension_numbers = #tpu.dot_dimension_numbers<[1], [0], [0], [1], [0, 0, 1, 1], [], []>} : vector<16x32xbf16>, vector<32x8xbf16>, vector<16x8xf32> -> vector<16x8xf32>
    %c0_29 = arith.constant 0 : index
    %c0_30 = arith.constant 0 : index
    %c0_31 = arith.constant 0 : index
    %35 = vector.load %arg12[%c0_29, %c0_30, %c0_31] : memref<1x1x8xf32, #tpu.memory_space<vmem>>, vector<1x1x8xf32>
    %36 = vector.shape_cast %35 : vector<1x1x8xf32> to vector<1x8xf32>
    %37 = vector.broadcast %36 : vector<1x8xf32> to vector<16x8xf32>
    %38 = arith.addf %34, %37 : vector<16x8xf32>
    %cst_32 = arith.constant 0.353553385 : f32
    %39 = vector.broadcast %cst_32 : f32 to vector<8x8xf32>
    %40 = arith.mulf %28, %39 : vector<8x8xf32>
    %41 = arith.truncf %40 : vector<8x8xf32> to vector<8x8xbf16>
    %42 = arith.truncf %33 : vector<16x8xf32> to vector<16x8xbf16>
    %cst_33 = arith.constant dense<0.000000e+00> : vector<8x16xf32>
    %43 = tpu.matmul %41, %42, %cst_33 {dimension_numbers = #tpu.dot_dimension_numbers<[1], [1], [0], [0], [0, 0, 1, 0], [], []>} : vector<8x8xbf16>, vector<16x8xbf16>, vector<8x16xf32> -> vector<8x16xf32>
    %c0_34 = arith.constant 0 : index
    %c0_35 = arith.constant 0 : index
    %44 = vector.load %arg16[%c0_34, %c0_35] : memref<8x16xf32, #tpu.memory_space<vmem>>, vector<8x16xf32>
    %45 = arith.addf %43, %44 : vector<8x16xf32>
    %cst_36 = arith.constant dense<0xFF800000> : vector<8xf32>
    %46 = vector.multi_reduction <maximumf>, %45, %cst_36 [1] : vector<8x16xf32> to vector<8xf32>
    %47 = vector.shape_cast %46 : vector<8xf32> to vector<8x1xf32>
    %48 = vector.broadcast %47 : vector<8x1xf32> to vector<8x16xf32>
    %49 = arith.subf %45, %48 : vector<8x16xf32>
    %50 = math.exp %49 : vector<8x16xf32>
    %cst_37 = arith.constant dense<0.000000e+00> : vector<8xf32>
    %51 = vector.multi_reduction <add>, %50, %cst_37 [1] : vector<8x16xf32> to vector<8xf32>
    %52 = vector.shape_cast %51 : vector<8xf32> to vector<8x1xf32>
    %53 = tpu.reciprocal %52 {approx = true} : vector<8x1xf32> -> vector<8x1xf32>
    %54 = vector.broadcast %53 : vector<8x1xf32> to vector<8x16xf32>
    %55 = arith.mulf %50, %54 : vector<8x16xf32>
    %56 = arith.truncf %55 : vector<8x16xf32> to vector<8x16xbf16>
    %57 = arith.truncf %38 : vector<16x8xf32> to vector<16x8xbf16>
    %cst_38 = arith.constant dense<0.000000e+00> : vector<8x8xf32>
    %58 = tpu.matmul %56, %57, %cst_38 {dimension_numbers = #tpu.dot_dimension_numbers<[1], [0], [0], [1], [0, 0, 1, 1], [], []>} : vector<8x16xbf16>, vector<16x8xbf16>, vector<8x8xf32> -> vector<8x8xf32>
    %59 = arith.truncf %58 : vector<8x8xf32> to vector<8x8xbf16>
    %cst_39 = arith.constant dense<0.000000e+00> : vector<8x32xf32>
    %60 = tpu.matmul %59, %23, %cst_39 {dimension_numbers = #tpu.dot_dimension_numbers<[1], [0], [0], [1], [0, 0, 1, 1], [], []>} : vector<8x8xbf16>, vector<8x32xbf16>, vector<8x32xf32> -> vector<8x32xf32>
    %c0_40 = arith.constant 0 : index
    %c0_41 = arith.constant 0 : index
    %61 = vector.load %arg17[%c0_40, %c0_41] : memref<8x32xf32, #tpu.memory_space<vmem>>, vector<8x32xf32>
    %62 = arith.addf %61, %60 : vector<8x32xf32>
    %c0_42 = arith.constant 0 : index
    %c0_43 = arith.constant 0 : index
    %63 = vector.load %arg17[%c0_42, %c0_43] : memref<8x32xf32, #tpu.memory_space<vmem>>, vector<8x32xf32>
    tpu.vector_store %arg17[%c0_42, %c0_43], %62 {strides = array<i32>} : memref<8x32xf32, #tpu.memory_space<vmem>>, vector<8x32xf32>,
    %c3_i32 = arith.constant 3 : i32
    %64 = arith.cmpi eq, %arg2, %c3_i32 : i32
    %65 = arith.extui %64 : i1 to i32
    %c0_i32_44 = arith.constant 0 : i32
    %66 = arith.cmpi ne, %65, %c0_i32_44 : i32
    scf.if %66 {
      %c0_45 = arith.constant 0 : index
      %c0_46 = arith.constant 0 : index
      %67 = vector.load %arg17[%c0_45, %c0_46] : memref<8x32xf32, #tpu.memory_space<vmem>>, vector<8x32xf32>
      %c0_47 = arith.constant 0 : index
      %c0_48 = arith.constant 0 : index
      %c0_49 = arith.constant 0 : index
      %68 = vector.load %arg15[%c0_47, %c0_48, %c0_49] : memref<1x8x32xf32, #tpu.memory_space<vmem>>, vector<1x8x32xf32>
      %69 = vector.shape_cast %68 : vector<1x8x32xf32> to vector<8x32xf32>
      %70 = vector.shape_cast %67 : vector<8x32xf32> to vector<1x8x32xf32>
      tpu.vector_store %arg15[%c0_47, %c0_48, %c0_49], %70 {strides = array<i32>} : memref<1x8x32xf32, #tpu.memory_space<vmem>>, vector<1x8x32xf32>,
    } else {
    }
    return
  }
  func.func @transform_0(%arg0: i32, %arg1: i32, %arg2: i32) -> (i32, i32, i32) {
    %c0_i32 = arith.constant 0 : i32
    %c0_i32_0 = arith.constant 0 : i32
    %c0_i32_1 = arith.constant 0 : i32
    return %arg0, %c0_i32, %c0_i32_0 : i32, i32, i32
  }
  func.func @transform_1(%arg0: i32, %arg1: i32, %arg2: i32) -> (i32, i32, i32) {
    %c0_i32 = arith.constant 0 : i32
    %c0_i32_0 = arith.constant 0 : i32
    return %arg0, %arg1, %c0_i32 : i32, i32, i32
  }
  func.func @transform_2(%arg0: i32, %arg1: i32, %arg2: i32) -> (i32, i32, i32) {
    %c0_i32 = arith.constant 0 : i32
    %c0_i32_0 = arith.constant 0 : i32
    %c0_i32_1 = arith.constant 0 : i32
    return %arg0, %c0_i32, %c0_i32_0 : i32, i32, i32
  }
  func.func @transform_3(%arg0: i32, %arg1: i32, %arg2: i32) -> (i32, i32, i32) {
    %c0_i32 = arith.constant 0 : i32
    %c0_i32_0 = arith.constant 0 : i32
    %c0_i32_1 = arith.constant 0 : i32
    return %arg0, %c0_i32, %c0_i32_0 : i32, i32, i32
  }
  func.func @transform_4(%arg0: i32, %arg1: i32, %arg2: i32) -> (i32, i32, i32) {
    %c0_i32 = arith.constant 0 : i32
    %c0_i32_0 = arith.constant 0 : i32
    %c0_i32_1 = arith.constant 0 : i32
    return %arg2, %c0_i32, %c0_i32_0 : i32, i32, i32
  }
  func.func @transform_5(%arg0: i32, %arg1: i32, %arg2: i32) -> (i32, i32, i32) {
    %c0_i32 = arith.constant 0 : i32
    %c0_i32_0 = arith.constant 0 : i32
    %c0_i32_1 = arith.constant 0 : i32
    return %arg2, %c0_i32, %c0_i32_0 : i32, i32, i32
  }
  func.func @transform_6(%arg0: i32, %arg1: i32, %arg2: i32) -> (i32, i32, i32) {
    %c0_i32 = arith.constant 0 : i32
    %c0_i32_0 = arith.constant 0 : i32
    %c0_i32_1 = arith.constant 0 : i32
    return %arg2, %c0_i32, %c0_i32_0 : i32, i32, i32
  }
  func.func @transform_7(%arg0: i32, %arg1: i32, %arg2: i32) -> (i32, i32, i32) {
    %c0_i32 = arith.constant 0 : i32
    %c0_i32_0 = arith.constant 0 : i32
    %c0_i32_1 = arith.constant 0 : i32
    return %arg2, %c0_i32, %c0_i32_0 : i32, i32, i32
  }
  func.func @transform_8(%arg0: i32, %arg1: i32, %arg2: i32) -> (i32, i32, i32) {
    %c0_i32 = arith.constant 0 : i32
    %c0_i32_0 = arith.constant 0 : i32
    %c0_i32_1 = arith.constant 0 : i32
    return %arg2, %c0_i32, %c0_i32_0 : i32, i32, i32
  }
  func.func @transform_9(%arg0: i32, %arg1: i32, %arg2: i32) -> (i32, i32, i32) {
    %c0_i32 = arith.constant 0 : i32
    %c0_i32_0 = arith.constant 0 : i32
    %c0_i32_1 = arith.constant 0 : i32
    return %arg2, %c0_i32, %c0_i32_0 : i32, i32, i32
  }
  func.func @transform_10(%arg0: i32, %arg1: i32, %arg2: i32) -> (i32, i32, i32) {
    %c0_i32 = arith.constant 0 : i32
    %c0_i32_0 = arith.constant 0 : i32
    %c0_i32_1 = arith.constant 0 : i32
    return %arg2, %c0_i32, %c0_i32_0 : i32, i32, i32
  }
  func.func @transform_11(%arg0: i32, %arg1: i32, %arg2: i32) -> (i32, i32) {
    %c0_i32 = arith.constant 0 : i32
    %c0_i32_0 = arith.constant 0 : i32
    %c0_i32_1 = arith.constant 0 : i32
    return %c0_i32, %c0_i32_0 : i32, i32
  }
  func.func @transform_12(%arg0: i32, %arg1: i32, %arg2: i32) -> (i32, i32, i32) {
    %c0_i32 = arith.constant 0 : i32
    %c0_i32_0 = arith.constant 0 : i32
    return %arg0, %arg1, %c0_i32 : i32, i32, i32
  }
}

</mosaic_0001>

<bundles_post_ra>
// kernel: tpu_custom_call.1
= control target key start
LH: loop header
LB: loop body
LE: loop exit
PB: predicated region body
PF: predicated region fallthrough
CT: control target
= control target key end

     0   :  { %s1845_s0 = inlined_call_operand.vmem [shape: f32[2,1,16], index: 0, kind: input, shape index: {}]   ;;  %s1846_s1 = inlined_call_operand.vmem [shape: f32[2,16,32], index: 1, kind: input, shape index: {}]   ;;  %s1847_s2 = inlined_call_operand.vmem [shape: f32[2,16,32], index: 2, kind: input, shape index: {}]   ;;  %s1848_s3 = inlined_call_operand.vmem [shape: f32[2,16,32], index: 3, kind: input, shape index: {}]   ;;  %s1849_s4 = inlined_call_operand.vmem [shape: f32[4,32,8], index: 4, kind: input, shape index: {}]   ;;  %s1850_s5 = inlined_call_operand.vmem [shape: f32[4,1,8], index: 5, kind: input, shape index: {}]   ;;  %s1851_s6 = inlined_call_operand.vmem [shape: f32[4,32,8], index: 6, kind: input, shape index: {}]   ;;  %s1852_s7 = inlined_call_operand.vmem [shape: f32[4,1,8], index: 7, kind: input, shape index: {}]   ;;  %s1853_s8 = inlined_call_operand.vmem [shape: f32[4,32,8], index: 8, kind: input, shape index: {}]   ;;  %s1854_s9 = inlined_call_operand.vmem [shape: f32[4,1,8], index: 9, kind: input, shape index: {}]   ;;  %s1855_s10 = inlined_call_operand.vmem [shape: f32[4,8,32], index: 10, kind: input, shape index: {}]   ;;  %s1856_s11 = inlined_call_operand.vmem [shape: f32[1,32], index: 11, kind: input, shape index: {}]   ;;  %s1857_s12 = inlined_call_operand.hbm [shape: f32[2,16,32], index: 12, kind: output, shape index: {}]  }
   0x1   :  { %1876 = sst [smem:[#allocation23_spill]] %s1845_s0 }
   0x2   :  { %1877 = sst [smem:[#allocation24_spill]] %s1846_s1 }
   0x3   :  { %1878 = sst [smem:[#allocation25_spill]] %s1847_s2 }
   0x4   :  { %1879 = sst [smem:[#allocation26_spill]] %s1848_s3 }
   0x5   :  { %1880 = sst [smem:[#allocation27_spill]] %s1849_s4 }
   0x6   :  { %1881 = sst [smem:[#allocation28_spill]] %s1857_s12 }
   0x7   :  { %17 = vsyncpa [#allocation5], 0 }
   0x8   :  { %19 = vsyncpa [#allocation5 + $0x1], 0  ;;  %s1567_s21 = smov 0   ;;  %s1569_s22 = smov 0  }
   0x9   :  { %s1571_s23 = smov 0   ;;  %s1573_s24 = smov 0  }
   0xa   :  { %s1575_s25 = smov 0   ;;  %s1577_s26 = smov 0  }
   0xb   :  { %s1579_s27 = smov 0   ;;  %s1581_s28 = smov 0  }
   0xc   :  { %s1583_s29 = smov 0   ;;  %s1585_s30 = smov 0  }
   0xd LB: > { %1882 = sst [smem:[#allocation7_spill]] %s1461_s21  ;;  %s1195_s13 = sadd.s32 4294967295, %s1497_s30   ;;  %s1497_s30 = sphi %s1585_s30, %s25_s30   ;;  %s1493_s29 = sphi %s1583_s29, %s1924_s29   ;;  %s1489_s28 = sphi %s1581_s28, %s1923_s28   ;;  %s1485_s27 = sphi %s1579_s27, %s1922_s27   ;;  %s1481_s26 = sphi %s1577_s26, %s1921_s26   ;;  %s1477_s25 = sphi %s1575_s25, %s1920_s25   ;;  %s1473_s24 = sphi %s1573_s24, %s1919_s24   ;;  %s1469_s23 = sphi %s1571_s23, %s1918_s23   ;;  %s1465_s22 = sphi %s1569_s22, %s1917_s22   ;;  %s1461_s21 = sphi %s1567_s21, %s1916_s21  }
   0xe   : > { %1883 = sst [smem:[#allocation8_spill]] %s1465_s22  ;;  %s1196_s14 = sadd.s32 4294967294, %s1497_s30  }
   0xf   : > { %1884 = sst [smem:[#allocation9_spill]] %s1469_s23  ;;  %s37_s15 = sadd.s32 1, %s1485_s27 }
  0x10   : > { %1885 = sst [smem:[#allocation10_spill]] %s1477_s25  ;;  %p38_p0 = scmp.ge.s32.totalorder %s37_s15, 4 }
  0x11   : > { %1886 = sst [smem:[#allocation11_spill]] %s1481_s26  ;;  %s40_s16 = sadd.s32 1, %s1489_s28 }
  0x12   : > { %1887 = sst [smem:[#allocation12_spill]] %s1485_s27  ;;  %s44_s17 = sadd.s32 1, %s1493_s29 }
  0x13   : > { %1888 = sst [smem:[#allocation13_spill]] %s1489_s28  ;;  %p372_p1 = scmp.ne.s32.totalorder %s1469_s23, %s1465_s22 }
  0x14   : > { %1889 = sst [smem:[#allocation14_spill]] %s1493_s29  ;;  %s1926_s15 = smov (%p38_p0, %s37_s15), 0 }
  0x15   : > { %1890 = sst [smem:[#allocation15_spill]] %s1497_s30  ;;  %s1928_s16 = smov (!%p38_p0, %s40_s16), %s1489_s28 }
  0x16   : > { %1891 = sst [smem:[#allocation16_spill]] %s1926_s15  ;;  %p373_p2 = scmp.eq.s32.totalorder %s1195_s13, 15 }
  0x17   : > { %p378_p3 = scmp.ne.s32.totalorder %s1465_s22, %s1461_s21  ;;  %p42_p4 = scmp.ge.s32.totalorder %s1928_s16, 2 }
  0x18   : > { %p379_p5 = scmp.eq.s32.totalorder %s1196_s14, 15  ;;  %p1629_p6 = por %p373_p2, %p372_p1 }
  0x19   : > { %s1930_s16 = smov (%p42_p4, %s1928_s16), 0  ;;  %s1932_s17 = smov (!%p42_p4, %s44_s17), %s1493_s29 }
  0x1a   : > { %s1892_s18 = scalar_select %p1629_p6, 1, 0 }
  0x1b   : > { %1894 = sst [smem:[#allocation18_spill]] %s1930_s16  ;;  %p1636_p7 = por %p379_p5, %p378_p3 }
  0x1c   : > { %1893 = sst [smem:[#allocation17_spill]] %s1892_s18  ;;  %p1199_p8 = scmp.ge.s32.totalorder %s1497_s30, 1 }
  0x1d   : > { %s1895_s19 = scalar_select %p1636_p7, 1, 0 }
  0x1e   : > { %p46_p9 = scmp.ge.s32.totalorder %s1932_s17, 2  ;;  %p482_p10 = scmp.lt.s32.totalorder %s1497_s30, 17 }
  0x1f   : > { %1896 = sst [smem:[#allocation19_spill]] %s1895_s19  ;;  %s358_s20 = ssub.s32 %s1489_s28, %s1930_s16 }
  0x20   : > { %s1934_s17 = smov (%p46_p9, %s1932_s17), 0  ;;  %p483_p11 = pnand %p1199_p8, %p482_p10 }
  0x21   : > { %1897 = sst [smem:[#allocation20_spill]] %s1934_s17  ;;  %s357_s13 = ssub.s32 %s1493_s29, %s1934_s17 }
  0x22   : > { %s359_s14 = sor.u32 %s358_s20, %s357_s13  ;;  %s362_s15 = sadd.s32 1, %s1469_s23 }
  0x23   : > { %p360_p12 = scmp.eq.s32.totalorder %s359_s14, 0  ;;  %486 = sbr.rel (%p483_p11) target bundleno = 1300 (0x514), region = 68 }
  0x25   : > { %s1650_s27 = scalar_select %p360_p12, %s1469_s23, %s362_s15  }
  0x27   : > { %1898 = sst [smem:[#allocation21_spill]] %s1650_s27 }
  0x2a   : > { %s1869_s16 = sand.u32 1, %s1465_s22   ;;  %p568_p13 = scmp.lt.s32.totalorder %s1481_s26, 1 }
  0x2b   : > { %s1656_s28 = sshll.u32 %s1869_s16, 3  ;;  %p573_p0 = scmp.lt.s32.totalorder %s1477_s25, 1 }
  0x2c   : > { %p589_p1 = scmp.lt.s32.totalorder %s1473_s24, 3  ;;  %s1899_s0 = sld [smem:[#allocation23_spill]] }
  0x2d   : > { %s569_s20 = scalar_select %p568_p13, %s1481_s26, 1 }
  0x2e   : > { %s574_s13 = scalar_select %p573_p0, %s1477_s25, 1 }
  0x2f   : > { %s1201_s29 = sshll.u32 %s569_s20, 1  ;;  %s1232_s23 = sshll.u32 %s569_s20, 4 }
  0x30   : > { %s576_s27 = sadd.s32 %s1201_s29, %s574_s13  ;;  %s1900_s2 = sld [smem:[#allocation25_spill]] }
  0x31   : > { %s1202_s19 = sshll.u32 %s576_s27, 3  ;;  %s1901_s1 = sld [smem:[#allocation24_spill]] }
  0x32   : > { %s570_s17 = scalar_lea.vmem %s1899_s0, %s569_s20  ;;  %s1902_s3 = sld [smem:[#allocation26_spill]] }
  0x33   : > { %s1681_s14 = scalar_select %p589_p1, %s1473_s24, 3 }
  0x34   : > { %s1904_s4 = sld [smem:[#allocation27_spill]]  ;;  %s567_s25 = scalar_lea.vmem [#allocation4], %s1656_s28 }
  0x35   : > { %s1234_s21 = sshll.u32 %s1681_s14, 5  ;;  %s604_s0 = scalar_lea.vmem %s1852_s7, %s1681_s14 }
  0x36   : > { %s1668_s12 = scalar_lea.vmem %s1900_s2, %s1232_s23  ;;  %s601_s26 = scalar_lea.vmem %s1851_s6, %s1234_s21 }
  0x37   : > { %s1673_s22 = scalar_lea.vmem %s1901_s1, %s1202_s19  ;;  %s612_s30 = scalar_lea.vmem %s1854_s9, %s1681_s14 }
  0x38   : > { %s1678_s15 = scalar_lea.vmem %s1902_s3, %s1232_s23  ;;  %s1703_s3 = scalar_lea.vmem %s1853_s8, %s1234_s21 }
  0x39   : > { %1903 = sst [smem:[#allocation22_spill]] %s1678_s15  ;;  %s1213_s16 = sshll.u32 %s1681_s14, 3 }
  0x3a   : > { %s1691_s19 = scalar_lea.vmem %s1904_s4, %s1234_s21  ;;  %s1713_s15 = scalar_lea.vmem %s1855_s10, %s1213_s16 }
  0x3b   : > { %p1214_p2 = scmp.ne.s32.totalorder %s1473_s24, 0 }
  0x3c   : > { %v1215_v0 = vld [vmem:[%s570_s17] ss:$0 sm:$0xff] (!%p1214_p2)  ;;  %vm630_vm0 = vcmask (!%p1214_p2), 130048   ;;  %vm639_vm1 = vcmask (!%p1214_p2), 261120  }
  0x3d   : > { %621 = sbr.rel (%p1214_p2) target bundleno = 68 (0x44), region = 72  ;;  %v1216_v1 = vld [vmem:[%s1856_s11] ss:$0 sm:$0xff] (!%p1214_p2)  ;;  %v629_v2 = vmul.f32 (!%p1214_p2), -1e+09, %v1215_v0 }
  0x3e   : > { %640 = vst.msk [vmem:[#allocation3] sm:$0xff] (!%p1214_p2), %vm639_vm1, %v1216_v1 }
  0x3f   : > { %631 = vst.msk [vmem:[#allocation2] sm:$0xff] (!%p1214_p2), %vm630_vm0, %v629_v2 }
  0x44 PF: > { %v655_v3 = vld [vmem:[%s601_s26] sm:$0xff]  ;;  %v656_v4 = vld [vmem:[%s601_s26 + $0x8] sm:$0xff]  ;;  %v657_v5 = vld [vmem:[%s601_s26 + $0x10] sm:$0xff]  ;;  %v1499_v6 = vmov 0.0   ;;  %vm1500_vm2 = vmmov 0   ;;  %vm676_vm3 = vcmask 261120   ;;  %s1905_s17 = scalar_lea.vmem %s1850_s5, %s1681_s14 }
  0x45   : > { %1260 = vmatprep.subr.bf16.mxu1 %v1499_v6  ;;  %v659_v7 = vpack.c.bf16 %v656_v4, %v655_v3  ;;  %v658_v8 = vld [vmem:[%s601_s26 + $0x18] sm:$0xff]  ;;  %1252 = vmatprep.subr.bf16.mxu0 %v1499_v6  ;;  %v649_v9 = vld [vmem:[%s1691_s19] sm:$0xff]  ;;  %v650_v10 = vld [vmem:[%s1691_s19 + $0x8] sm:$0xff]  ;;  %vm826_vm4 = vcmask 64512   ;;  %vm873_vm5 = vcmask 130048   ;;  %vm934_vm6 = vcmask 1043456  }
  0x46   : > { %v653_v11 = vpack.c.bf16 %v650_v10, %v649_v9  ;;  %1264 = vmatprep.mubr.msk.bf16.mxu1 %vm1500_vm2, %v1499_v6  ;;  %v651_v12 = vld [vmem:[%s1691_s19 + $0x10] sm:$0xff]  ;;  %1256 = vmatprep.mubr.msk.bf16.mxu0 %vm1500_vm2, %v1499_v6  ;;  %v660_v13 = vpack.c.bf16 %v658_v8, %v657_v5  ;;  %v643_v14 = vld [vmem:[%s1668_s12] sm:$0xff]  ;;  %v644_v15 = vld [vmem:[%s1668_s12 + $0x8] sm:$0xff]  ;;  %p1226_p3 = scmp.ne.s32.totalorder %s1473_s24, 3 }
  0x47   : > { %1261 = vmatpush3.bf16.msra.mxu1 %v659_v7  ;;  %v652_v16 = vld [vmem:[%s1691_s19 + $0x18] sm:$0xff]  ;;  %v641_v18 = vld [vmem:[%s1673_s22] sm:$0xff]  ;;  %v645_v19 = vpack.c.bf16 %v644_v15, %v643_v14  ;;  %v662_v39 = vld [vmem:[%s1703_s3 + $0x8] sm:$0xff] }
  0x48   : > { %1262 = vmatprep.subr.bf16.mxu1 %v1499_v6  ;;  %1253 = vmatpush3.bf16.msra.mxu0 %v653_v11  ;;  %v654_v17 = vpack.c.bf16 %v652_v16, %v651_v12  ;;  %v642_v20 = vpack.c.bf16 %v641_v18, %v641_v18  ;;  %v1219_v21 = vld [vmem:[%s604_s0] ss:$0 sm:$0xff]  ;;  %s1906_s0 = sld [smem:[#allocation22_spill]]  ;;  %v663_v40 = vld [vmem:[%s1703_s3 + $0x10] sm:$0xff]  ;;  %v664_v42 = vld [vmem:[%s1703_s3 + $0x18] sm:$0xff] }
  0x49   : > { %1254 = vmatprep.subr.bf16.mxu0 %v1499_v6  ;;  %v1217_v23 = vld [vmem:[%s1905_s17] ss:$0 sm:$0xff]  ;;  %v666_v43 = vpack.c.bf16 %v664_v42, %v663_v40  ;;  %v978_v15 = vld [vmem:[#allocation3] sm:$0xff] }
  0x4a   : > { %v661_v38 = vld [vmem:[%s1703_s3] sm:$0xff] }
  0x4b   : > { %1263 = vmatpush3.bf16.msra.mxu1 %v660_v13  ;;  %v665_v41 = vpack.c.bf16 %v662_v39, %v661_v38  ;;  %v825_v47 = vld [vmem:[#allocation2] sm:$0xff] }
  0x4c   : > { %1255 = vmatpush3.bf16.msra.mxu0 %v654_v17  ;;  %1276 = vmatprep.subr.bf16.mxu1 %v1499_v6  ;;  %v1221_v61 = vld [vmem:[%s612_s30] ss:$0 sm:$0xff] }
  0x4d   : > { %1268 = vmatprep.subr.bf16.mxu0 %v1499_v6  ;;  %v667_v3 = vld [vmem:[%s1713_s15] sm:$0xff] }
  0x4e   : > { %1265 = vmatmul.mubr.msk.bf16.vlgmr.msra.gmra.mrb[0].mxu1 %vm676_vm3, %v645_v19  ;;  %v646_v44 = vld [vmem:[%s1906_s0] sm:$0xff]  ;;  %v647_v45 = vld [vmem:[%s1906_s0 + $0x8] sm:$0xff]  ;;  %v668_v4 = vpack.c.bf16 %v667_v3, %v667_v3 }
  0x4f   : > { %1257 = vmatmul.mubr.msk.bf16.vlgmr.msra.gmra.mrb[0].mxu0 %vm676_vm3, %v642_v20  ;;  %1278 = vmatprep.mubr.msk.bf16.mxu1 %vm1500_vm2, %v1499_v6  ;;  %v648_v46 = vpack.c.bf16 %v647_v45, %v646_v44 }
  0x50   : > { %1272 = vmatprep.mubr.msk.bf16.mxu0 %vm1500_vm2, %v1499_v6  ;;  %1269 = vmatpush3.bf16.msra.mxu0 %v665_v41  ;;  %v936_v5 = vsel %vm934_vm6, %v668_v4, 0 }
  0x51   : > { %1270 = vmatprep.subr.bf16.mxu0 %v1499_v6 }
  0x54   : > { %1271 = vmatpush3.bf16.msra.mxu0 %v666_v43 }
  0x55   : > { %1282 = vmatprep.subr.bf16.mxu0 %v1499_v6 }
  0x57   : > { %1273 = vmatmul.mubr.msk.bf16.vlgmr.msra.gmra.mrb[4].mxu0 %vm676_vm3, %v648_v46 }
  0x58   : > { %1284 = vmatprep.mubr.msk.bf16.mxu0 %vm1500_vm2, %v1499_v6 }
 0x121   : > { %v764_v22 = vpop.f32.mrb[0].mxu1 }
 0x122   : > { %v1266_v24 = vpop.f32.mrb[1].mxu1  ;;  %v714_v25 = vpop.f32.mrb[0].mxu0  ;;  %v765_v28 = vadd.f32 %v1219_v21, %v764_v22 }
 0x123   : > { %v767_v26 = vpop.f32.mrb[2].mxu1  ;;  %v1258_v27 = vpop.f32.mrb[1].mxu0  ;;  %v715_v31 = vadd.f32 %v1217_v23, %v714_v25 }
 0x124   : > { %v768_v29 = vadd.f32 %v1219_v21, %v767_v26  ;;  %v1267_v30 = vpop.f32.mrb[3].mxu1  ;;  %v717_v32 = vpop.f32.mrb[2].mxu0 }
 0x125   : > { %v1259_v33 = vpop.f32.mrb[3].mxu0  ;;  %v822_v35 = vmul.f32 0.35355338, %v715_v31 }
 0x126   : > { %v824_v34 = vpack.c.bf16 %v768_v29, %v765_v28 }
 0x127   : > { %v823_v37 = vpack.c.bf16 %v822_v35, %v822_v35 }
 0x128   : > { %v831_v36 = vsel %vm826_vm4, %v824_v34, 0 }
 0x129   : > { %1277 = vmatpush3.bf16.xpose.msra.mxu1 %v831_v36 }
 0x12a   : > { %1288 = vmatprep.subr.bf16.mxu1 %v1499_v6  ;;  %v815_v54 = vpop.f32.mrb[4].mxu0 }
 0x12b   : > { %v1274_v55 = vpop.f32.mrb[5].mxu0  ;;  %v816_v62 = vadd.f32 %v1221_v61, %v815_v54 }
 0x12c   : > { %v818_v63 = vpop.f32.mrb[6].mxu0 }
 0x12d   : > { %v1275_v0 = vpop.f32.mrb[7].mxu0  ;;  %v819_v1 = vadd.f32 %v1221_v61, %v818_v63 }
 0x12f   : > { %v886_v2 = vpack.c.bf16 %v819_v1, %v816_v62 }
 0x130   : > { %1279 = vmatmul.mubr.msk.bf16.vlgmr.msra.gmra.mrb[4].mxu1 %vm826_vm4, %v823_v37 }
 0x131   : > { %1290 = vmatprep.mubr.msk.bf16.mxu1 %vm1500_vm2, %v1499_v6  ;;  %1283 = vmatpush3.bf16.msra.mxu0 %v886_v2 }
 0x132   : > { %1289 = vmatpush3.bf16.msra.mxu1 %v936_v5 }
 0x203   : > { %v867_v48 = vpop.f32.mrb[4].mxu1 }
 0x204   : > { %v868_v49 = vadd.f32 %v867_v48, %v825_v47  ;;  %v1280_v50 = vpop.f32.mrb[5].mxu1 }
 0x205   : > { %v870_v51 = vpop.f32.mrb[6].mxu1 }
 0x206   : > { %v1281_v52 = vpop.f32.mrb[7].mxu1  ;;  %v874_v53 = vsel %vm873_vm5, %v868_v49, -inf }
 0x207   : > { %875 = vmax.xlane.f32.xlu0 %v874_v53 }
 0x294   : > { %v876_v56 = vpop.xlane.xlu0 %875 }
 0x295   : > { %v877_v57 = vsub.f32 %v868_v49, %v876_v56 }
 0x297   : > { %v878_v58 = vmul.f32 1.442695, %v877_v57 }
 0x299   : > { %1383 = vpow2.f32 %v878_v58 }
 0x2a3   : > { %v1384_v59 = vpop.eup %1383 }
 0x2a4   : > { %v880_v60 = vsel %vm873_vm5, %v1384_v59, 0.0 }
 0x2a5   : > { %881 = vadd.xlane.f32.xlu0 %v880_v60 }
 0x332   : > { %v882_v6 = vpop.xlane.xlu0 %881 }
 0x333   : > { %1385 = vrcp.f32 %v882_v6 }
 0x33d   : > { %v1386_v7 = vpop.eup %1385 }
 0x33e   : > { %v884_v8 = vmul.f32 %v1386_v7, %v1384_v59 }
 0x340   : > { %v885_v9 = vpack.c.bf16 %v884_v8, %v884_v8 }
 0x342   : > { %1285 = vmatmul.mubr.msk.bf16.vlgmr.msra.gmra.mrb[8].mxu0 %vm873_vm5, %v885_v9 }
 0x415   : > { %v924_v10 = vpop.f32.mrb[8].mxu0 }
 0x416   : > { %v930_v11 = vpack.c.bf16 %v924_v10, %v924_v10  ;;  %v1286_v12 = vpop.f32.mrb[9].mxu0 }
 0x417   : > { %v927_v13 = vpop.f32.mrb[10].mxu0 }
 0x418   : > { %v1287_v14 = vpop.f32.mrb[11].mxu0  ;;  %1291 = vmatmul.mubr.msk.bf16.vlgmr.msra.gmra.mrb[8].mxu1 %vm826_vm4, %v930_v11 }
 0x4e8   : > { %984 = sbr.rel (%p1226_p3) target bundleno = 1271 (0x4f7), region = 76 }
 0x4eb   : > { %v972_v16 = vpop.f32.mrb[8].mxu1 }
 0x4ec   : > { %v979_v17 = vadd.f32 %v978_v15, %v972_v16  ;;  %v1292_v18 = vpop.f32.mrb[9].mxu1 }
 0x4ed   : > { %v975_v19 = vpop.f32.mrb[10].mxu1 }
 0x4ee   : > { %980 = vst.msk [vmem:[#allocation3] sm:$0xff] %vm676_vm3, %v979_v17  ;;  %v1293_v20 = vpop.f32.mrb[11].mxu1 }
 0x4f5   : > { %v985_v21 = vld [vmem:[#allocation3] sm:$0xff] }
 0x4f6   : > { %986 = vst.msk [vmem:[%s567_s25] sm:$0xff] %vm676_vm3, %v985_v21 }
 0x4f7 PF: > { %s1907_s15 = sld [smem:[#allocation11_spill]]  ;;  %s1908_s14 = sld [smem:[#allocation10_spill]] }
 0x4f8   : > { %s1909_s30 = sld [smem:[#allocation8_spill]]  ;;  %s1003_s13 = sshll.u32 %s567_s25, 4  ;;  %s1788_s13 = int_to_ptr.vmem [resolvable:$true] %s1003_s13 }
 0x4f9   : > { %s1911_s16 = sld [smem:[#allocation28_spill]]  ;;  %s1387_s2 = scalar_lea.vmem %s1788_s13, 128 }
 0x4fa   : > { %p1388_p4 = scmp.ne.s32.totalorder %s1788_s13, %s1387_s2  ;;  %s1501_s4 = smov [#allocation4]  }
 0x4fb   : > { %s1391_s28 = sshll.u32 %s1501_s4, 4  ;;  %s1392_s28 = int_to_ptr.vmem [resolvable:$false] %s1391_s28 }
 0x4fc   : > { %p1389_p5 = pnand %p1388_p4, %p1629_p6  ;;  %s1393_s25 = scalar_lea.vmem %s1392_s28, 256 }
 0x4fd   : > { %s1228_s26 = sshll.u32 %s1907_s15, 1  ;;  %p1394_p9 = scmp.lt.s32.totalorder %s1788_s13, %s1392_s28 }
 0x4fe   : > { %s999_s20 = sadd.s32 %s1908_s14, %s1228_s26  ;;  %s1912_s23 = sand.u32 1, %s1909_s30  }
 0x4ff   : > { %s1229_s27 = sshll.u32 %s999_s20, 7  ;;  %s988_s1 = scalar_lea.sflag [#allocation5], %s1912_s23 }
 0x500   : > { %s1001_s18 = scalar_lea.hbm %s1911_s16, %s1229_s27  ;;  %p1390_p8 = pneg %p1389_p5 }
 0x501   : > { %p1395_p10 = scmp.lt.s32.totalorder %s1393_s25, %s1387_s2 }
 0x503   : > { %p1396_p11 = por %p1395_p10, %p1394_p9 }
 0x505   : > { %p1397_p12 = pnand %p1396_p11, %p1390_p8 }
 0x507   : > { %1400 = shalt.err (!%p1397_p12)
}
 0x508   : > { %s1401_s12 = scalar_lea.hbm %s1001_s18, 128  ;;  %s1405_s0 = scalar_lea.hbm %s1911_s16, 512 }
 0x509   : > { %p1402_p13 = scmp.ne.s32.totalorder %s1001_s18, %s1401_s12  ;;  %p1406_p2 = scmp.lt.u32.totalorder %s1001_s18, %s1911_s16 }
 0x50a   : > { %p1407_p3 = scmp.lt.u32.totalorder %s1405_s0, %s1401_s12  ;;  %p1409_p5 = scmp.lt.u32.totalorder %s1401_s12, %s1001_s18 }
 0x50b   : > { %p1403_p0 = pnand %p1402_p13, %p1629_p6 }
 0x50c   : > { %p1408_p4 = por %p1407_p3, %p1406_p2 }
 0x50d   : > { %p1404_p1 = pneg %p1403_p0 }
 0x50e   : > { %p1410_p9 = por %p1409_p5, %p1408_p4 }
 0x510   : > { %p1411_p8 = pnand %p1410_p9, %p1404_p1 }
 0x512   : > { %1414 = shalt.err (!%p1411_p8)
}
 0x513   : > { %1294 = dma.vmem_to_hbm [thread:$0]  (%p1629_p6), %s1788_s13, 128, %s1001_s18, %s988_s1  }
 0x514 PF: > { %s1913_s15 = sld [smem:[#allocation15_spill]]  ;;  %s1914_s14 = sld [smem:[#allocation7_spill]] }
 0x51a   : > { %p1300_p10 = scmp.ge.s32.totalorder %s1913_s15, 2  ;;  %s1015_s26 = sand.u32 1, %s1914_s14  }
 0x51b   : > { %s1016_s20 = scalar_lea.sflag [#allocation5], %s1015_s26 }
 0x51c   : > { %p1297_p11 = pnand %p1300_p10, %p1636_p7 }
 0x51e   : > { %1456 = dma.done.wait (!%p1297_p11), %s1016_s20, 128  }
 0x51f   : > { %1458 = vsyncadd (!%p1297_p11), %s1016_s20, 4294967168  ;;  %s25_s30 = sadd.s32 1, %s1913_s15   ;;  %s1916_s21 = sld [smem:[#allocation8_spill]] }
 0x520   : > { %p22_p12 = scmp.ge.s32.totalorder %s25_s30, 18   ;;  %s1917_s22 = sld [smem:[#allocation9_spill]] }
 0x521   : > { %s1918_s23 = sld [smem:[#allocation21_spill]]  ;;  %s1919_s24 = sld [smem:[#allocation12_spill]] }
 0x522   : > { %s1920_s25 = sld [smem:[#allocation13_spill]]  ;;  %s1921_s26 = sld [smem:[#allocation14_spill]] }
 0x523   : > { %s1922_s27 = sld [smem:[#allocation16_spill]]  ;;  %s1923_s28 = sld [smem:[#allocation18_spill]] }
 0x524   : > { %s1924_s29 = sld [smem:[#allocation20_spill]]  ;;  %24 = sbr.rel (!%p22_p12) target bundleno = 13 (0xd), region = 141 }
 0x52b   :  { %1021 = vsyncpa [#allocation5], 1 }
 0x52c   :  { %1023 = vsyncpa [#allocation5 + $0x1], 1 }

</bundles_post_ra>
